<compile_context>
chip_gen: v7x
topology: tpu7x:2x2x1
jax: 0.10.0
libtpu: 0.0.40
codegen_flags: <defaults>
</compile_context>

<pallas_src>
import functools

import jax
import jax.numpy as jnp
from jax.experimental import pallas as pl
from jax.experimental.pallas import tpu as pltpu


def _bad_transformer_kernel(x_ref, pos_ref, we0_ref, we1_ref, wd0_ref, wd1_ref,
                            o_ref, *, compute_dtype, approx_recip, use_gram):
    """One batch chunk of the forward pass.

    x_ref   : (Bt, S, Dp) f32 activations (feature dim already zero-padded)
    pos_ref : (1,  S, Dp) f32 position-embedding window (first S rows)
    w*_ref  : (Dp, Dp)    weights, pre-transposed to (in, out) layout
    o_ref   : (Bt, S, Dp) f32 output (lane-dense: Dp % 128 == 0)
    """
    bt, s, d = x_ref.shape
    cd = compute_dtype

    # Position-embedding add (f32, VPU), then flatten batch*seq so every Linear is
    # ONE MXU matmul with M = bt*s rows instead of bt tiny (s, d) matmuls.
    y = (x_ref[...] + pos_ref[0]).reshape(bt * s, d)

    def linear_relu(v, w_ref):
        o = jnp.dot(v.astype(cd), w_ref[...], preferred_element_type=jnp.float32)
        return jnp.maximum(o, 0.0)

    # encodingGroup: (Linear(bias=False) -> ReLU) x 2
    y = linear_relu(y, we0_ref)
    y = linear_relu(y, we1_ref)

    # y = y / (||y||_2 + 1e-6).  Sum-of-squares reduction stays in f32; the divide
    # becomes a multiply by an EUP reciprocal (otherwise-idle slot).
    norm = jnp.sqrt(jnp.sum(y * y, axis=-1, keepdims=True))
    y = y * pl.reciprocal(norm + 1e-6, approx=approx_recip)

    # (y y^T) y as a batched dot_general.  No explicit `.T` (the contraction takes
    # the transposed operand directly -> no XLU relayout), no Python loop, no
    # concatenate.  Cast once, reuse in both matmuls.
    y3c = y.reshape(bt, s, d).astype(cd)
    if use_gram:
        # y (y^T y): keeps N = d full lanes and avoids the (s, s) intermediate.
        g = jnp.einsum("bsd,bse->bde", y3c, y3c,
                       preferred_element_type=jnp.float32)          # (bt, d, d)
        y3 = jnp.einsum("bsd,bde->bse", y3c, g.astype(cd),
                        preferred_element_type=jnp.float32)         # (bt, s, d)
    else:
        cmp = jnp.einsum("bsd,btd->bst", y3c, y3c,
                         preferred_element_type=jnp.float32)        # (bt, s, s)
        y3 = jnp.einsum("bst,btd->bsd", cmp.astype(cd), y3c,
                        preferred_element_type=jnp.float32)         # (bt, s, d)
    y = y3.reshape(bt * s, d)

    # decodingGroup: (Linear(bias=False) -> ReLU) x 2
    y = linear_relu(y, wd0_ref)
    y = linear_relu(y, wd1_ref)

    # Lane-dense store (last dim is a multiple of 128 after padding -> unmasked vst).
    o_ref[...] = y.reshape(bt, s, d).astype(o_ref.dtype)


def _default_num_chunks(B, S, *, min_rows=256, target_steps=4):
    """Pick the grid length over the batch.

    Aim for >= `target_steps` pipelined grid steps (hides DMA / writeback) while
    keeping bt*S >= `min_rows` so the MXU M dimension stays filled; prefer an even
    step count so the 'parallel' axis shards across both v7x TensorCores.
    """
    divisors = [c for c in range(1, B + 1) if B % c == 0]
    good = [c for c in divisors if (B // c) * S >= min_rows] or divisors
    ge = [c for c in good if c >= target_steps]
    c = min(ge) if ge else max(good)
    even_ge = [d for d in good if d >= c and d % 2 == 0]
    return min(even_ge) if even_ge else c


def bad_transformer_block(x, pos_emb, we0, we1, wd0, wd1, *,
                          use_bf16=True, approx_recip=False, num_chunks=None):
    """x: (B, S, D) f32; pos_emb: (1, max_seq_len, D); weights: (D, D) PyTorch (out, in).

    use_bf16    : cast matmul operands to bf16 (bf16-native MXU on v5e/v6e/v7x),
                  accumulate in f32; elementwise math stays f32.
    approx_recip: use the EUP approximate reciprocal for the normalization.
    num_chunks  : grid steps over the batch (None -> heuristic, see above).
    """
    B, S, D = x.shape
    assert pos_emb.shape[0] == 1 and pos_emb.shape[1] >= S and pos_emb.shape[2] == D

    compute_dtype = jnp.bfloat16 if use_bf16 else jnp.float32

    # ---- feature-dim zero padding to a full 128-lane multiple (semantically exact).
    Dp = max(128, ((D + 127) // 128) * 128)

    def prep_w(w):  # PyTorch (out, in) -> zero-padded, transposed (in, out), MXU dtype
        wp = jnp.zeros((Dp, Dp), w.dtype).at[:D, :D].set(w)
        return wp.T.astype(compute_dtype)

    we0t, we1t, wd0t, wd1t = (prep_w(w) for w in (we0, we1, wd0, wd1))

    if Dp != D:
        x_p = jnp.pad(x, ((0, 0), (0, 0), (0, Dp - D)))
        pos_p = jnp.pad(pos_emb, ((0, 0), (0, 0), (0, Dp - D)))
    else:
        x_p, pos_p = x, pos_emb

    # The pos-emb BlockSpec windows the first S rows; that needs S % 8 == 0 unless
    # the block spans the full sequence axis, so pre-slice in the ragged case.
    if S % 8 != 0 and pos_p.shape[1] != S:
        pos_p = pos_p[:, :S]

    # ---- batch chunking over a pipelined / core-parallel grid.
    if num_chunks is None:
        num_chunks = _default_num_chunks(B, S)
    if num_chunks < 1 or B % num_chunks != 0:
        num_chunks = 1
    bt = B // num_chunks

    # Gram associativity: avoid the (S, S) intermediate when S > Dp, and also when
    # S is lane-starved (< 128) so the inner matmuls keep N = Dp full lanes.
    use_gram = (S > Dp) or (S < 128)

    # ---- VMEM budget: raise v5e's 16 MiB default, cap at 64 MiB (v7x-safe).
    wb = jnp.dtype(compute_dtype).itemsize
    rows = bt * S
    est = (4 * 2 * Dp * Dp * wb            # 4 weights, double-buffered
           + 2 * 2 * rows * Dp * 4         # x block + out block, double-buffered
           + 2 * S * Dp * 4                # pos-emb window, double-buffered
           + 6 * rows * Dp * 4             # live activation intermediates
           + bt * (Dp * Dp if use_gram else S * S) * 4)   # Gram / cmp intermediate
    vmem_limit = int(min(64 * 1024 * 1024, max(32 * 1024 * 1024, 2 * est)))

    kernel = functools.partial(_bad_transformer_kernel,
                               compute_dtype=compute_dtype,
                               approx_recip=approx_recip,
                               use_gram=use_gram)

    w_spec = pl.BlockSpec((Dp, Dp), lambda c: (0, 0))
    out = pl.pallas_call(
        kernel,
        out_shape=jax.ShapeDtypeStruct((B, S, Dp), jnp.float32),
        grid=(num_chunks,),
        in_specs=[
            pl.BlockSpec((bt, S, Dp), lambda c: (c, 0, 0)),   # x batch chunk
            pl.BlockSpec((1, S, Dp), lambda c: (0, 0, 0)),    # pos-emb first-S window
            w_spec, w_spec, w_spec, w_spec,                   # pre-transposed weights
        ],
        out_specs=pl.BlockSpec((bt, S, Dp), lambda c: (c, 0, 0)),
        compiler_params=pltpu.CompilerParams(
            dimension_semantics=("parallel",),
            vmem_limit_bytes=vmem_limit),
    )(x_p, pos_p, we0t, we1t, wd0t, wd1t)

    return out[..., :D] if Dp != D else out


def reference_forward(x, pos_emb, we0, we1, wd0, wd1):
    """Pure-JAX mirror of the PyTorch forward for validation."""
    y = x + pos_emb[:, : x.shape[1]]
    y = jnp.maximum(y @ we0.T, 0.0)
    y = jnp.maximum(y @ we1.T, 0.0)
    y = y / (jnp.linalg.norm(y, axis=-1, keepdims=True) + 1e-6)
    cmp = jnp.einsum("bsd,btd->bst", y, y)
    y = jnp.einsum("bst,btd->bsd", cmp, y)
    y = jnp.maximum(y @ wd0.T, 0.0)
    y = jnp.maximum(y @ wd1.T, 0.0)
    return y


if __name__ == "__main__":
    B, S, D = 2, 8, 64          # module defaults: dim=64, max_seq_len=128
    MAX_SEQ_LEN = 128
    key = jax.random.PRNGKey(0)
    kx, kpos, k0, k1, k2, k3 = jax.random.split(key, 6)

    x = jax.random.normal(kx, (B, S, D), dtype=jnp.float32)
    pos_emb = jax.random.normal(kpos, (1, MAX_SEQ_LEN, D), dtype=jnp.float32)
    scale = 1.0 / jnp.sqrt(jnp.float32(D))
    we0 = jax.random.normal(k0, (D, D), dtype=jnp.float32) * scale
    we1 = jax.random.normal(k1, (D, D), dtype=jnp.float32) * scale
    wd0 = jax.random.normal(k2, (D, D), dtype=jnp.float32) * scale
    wd1 = jax.random.normal(k3, (D, D), dtype=jnp.float32) * scale

    ref = reference_forward(x, pos_emb, we0, we1, wd0, wd1)

    fwd = jax.jit(bad_transformer_block,
                  static_argnames=("use_bf16", "approx_recip", "num_chunks"))

    # f32 MXU-operand path, exact reciprocal: tight check against the reference
    # (tolerance allows for MXU matmul rounding / Gram-associativity reordering).
    out = jax.block_until_ready(
        fwd(x, pos_emb, we0, we1, wd0, wd1, use_bf16=False, approx_recip=False))
    assert out.shape == (B, S, D)
    assert jnp.allclose(out, ref, atol=2e-3, rtol=2e-3), "f32 kernel mismatch vs reference"

    # bf16 MXU-operand fast path (all chips), approx reciprocal: loose tolerance.
    out_bf16 = jax.block_until_ready(
        fwd(x, pos_emb, we0, we1, wd0, wd1, use_bf16=True, approx_recip=True))
    assert out_bf16.shape == (B, S, D)
    assert jnp.allclose(out_bf16, ref, atol=2e-1, rtol=1e-1), "bf16 kernel diverged from reference"

    print("KERNEL_OK")
</pallas_src>

<mosaic_0001>
module attributes {stable_mosaic.version = 11 : i64} {
  func.func @_bad_transformer_kernel(%arg0: i32, %arg1: memref<1x8x128xf32, #tpu.memory_space<vmem>>, %arg2: memref<1x8x128xf32, #tpu.memory_space<vmem>>, %arg3: memref<128x128xf32, #tpu.memory_space<vmem>>, %arg4: memref<128x128xf32, #tpu.memory_space<vmem>>, %arg5: memref<128x128xf32, #tpu.memory_space<vmem>>, %arg6: memref<128x128xf32, #tpu.memory_space<vmem>>, %arg7: memref<1x8x128xf32, #tpu.memory_space<vmem>>) attributes {dimension_semantics = [#tpu.dimension_semantics<parallel>], iteration_bounds = array<i64: 2>, scalar_prefetch = 0 : i64, scratch_operands = 0 : i64, tpu.core_type = #tpu.core_type<tc>, window_params = [{transform_indices = @transform_0, window_bounds = array<i64: 1, 8, 128>}, {transform_indices = @transform_1, window_bounds = array<i64: 1, 8, 128>}, {pipeline_mode = #tpu.pipeline_mode<synchronous>, transform_indices = @transform_2, window_bounds = array<i64: 128, 128>}, {pipeline_mode = #tpu.pipeline_mode<synchronous>, transform_indices = @transform_3, window_bounds = array<i64: 128, 128>}, {pipeline_mode = #tpu.pipeline_mode<synchronous>, transform_indices = @transform_4, window_bounds = array<i64: 128, 128>}, {pipeline_mode = #tpu.pipeline_mode<synchronous>, transform_indices = @transform_5, window_bounds = array<i64: 128, 128>}, {transform_indices = @transform_6, window_bounds = array<i64: 1, 8, 128>}]} {
    %c0 = arith.constant 0 : index
    %c0_0 = arith.constant 0 : index
    %c0_1 = arith.constant 0 : index
    %0 = vector.load %arg1[%c0, %c0_0, %c0_1] : memref<1x8x128xf32, #tpu.memory_space<vmem>>, vector<1x8x128xf32>
    %c0_2 = arith.constant 0 : index
    %c0_3 = arith.constant 0 : index
    %c0_4 = arith.constant 0 : index
    %1 = vector.load %arg2[%c0_2, %c0_3, %c0_4] : memref<1x8x128xf32, #tpu.memory_space<vmem>>, vector<1x8x128xf32>
    %2 = vector.shape_cast %1 : vector<1x8x128xf32> to vector<8x128xf32>
    %3 = vector.shape_cast %2 : vector<8x128xf32> to vector<1x8x128xf32>
    %4 = arith.addf %0, %3 : vector<1x8x128xf32>
    %5 = vector.shape_cast %4 : vector<1x8x128xf32> to vector<8x128xf32>
    %c0_5 = arith.constant 0 : index
    %c0_6 = arith.constant 0 : index
    %6 = vector.load %arg3[%c0_5, %c0_6] : memref<128x128xf32, #tpu.memory_space<vmem>>, vector<128x128xf32>
    %cst = arith.constant dense<0.000000e+00> : vector<8x128xf32>
    %7 = tpu.matmul %5, %6, %cst {dimension_numbers = #tpu.dot_dimension_numbers<[1], [0], [0], [1], [0, 0, 1, 1], [], []>} : vector<8x128xf32>, vector<128x128xf32>, vector<8x128xf32> -> vector<8x128xf32>
    %cst_7 = arith.constant 0.000000e+00 : f32
    %8 = vector.broadcast %cst_7 : f32 to vector<8x128xf32>
    %9 = arith.maximumf %7, %8 : vector<8x128xf32>
    %c0_8 = arith.constant 0 : index
    %c0_9 = arith.constant 0 : index
    %10 = vector.load %arg4[%c0_8, %c0_9] : memref<128x128xf32, #tpu.memory_space<vmem>>, vector<128x128xf32>
    %cst_10 = arith.constant dense<0.000000e+00> : vector<8x128xf32>
    %11 = tpu.matmul %9, %10, %cst_10 {dimension_numbers = #tpu.dot_dimension_numbers<[1], [0], [0], [1], [0, 0, 1, 1], [], []>} : vector<8x128xf32>, vector<128x128xf32>, vector<8x128xf32> -> vector<8x128xf32>
    %cst_11 = arith.constant 0.000000e+00 : f32
    %12 = vector.broadcast %cst_11 : f32 to vector<8x128xf32>
    %13 = arith.maximumf %11, %12 : vector<8x128xf32>
    %14 = arith.mulf %13, %13 : vector<8x128xf32>
    %cst_12 = arith.constant dense<0.000000e+00> : vector<8xf32>
    %15 = vector.multi_reduction <add>, %14, %cst_12 [1] : vector<8x128xf32> to vector<8xf32>
    %16 = vector.shape_cast %15 : vector<8xf32> to vector<8x1xf32>
    %17 = math.sqrt %16 : vector<8x1xf32>
    %cst_13 = arith.constant 9.99999997E-7 : f32
    %18 = vector.broadcast %cst_13 : f32 to vector<8x1xf32>
    %19 = arith.addf %17, %18 : vector<8x1xf32>
    %20 = tpu.reciprocal %19 : vector<8x1xf32> -> vector<8x1xf32>
    %21 = vector.broadcast %20 : vector<8x1xf32> to vector<8x128xf32>
    %22 = arith.mulf %13, %21 : vector<8x128xf32>
    %23 = vector.shape_cast %22 : vector<8x128xf32> to vector<1x8x128xf32>
    "tpu.trace_start"() <{level = 10 : i32, message = "bsd,bse->bde"}> : () -> ()
    %cst_14 = arith.constant dense<0.000000e+00> : vector<1x128x128xf32>
    %24 = tpu.matmul %23, %23, %cst_14 {dimension_numbers = #tpu.dot_dimension_numbers<[1], [1], [2], [2], [0, 0, 0, 2, 1, 2], [0], [0]>} : vector<1x8x128xf32>, vector<1x8x128xf32>, vector<1x128x128xf32> -> vector<1x128x128xf32>
    "tpu.trace_stop"() : () -> ()
    "tpu.trace_start"() <{level = 10 : i32, message = "bsd,bde->bse"}> : () -> ()
    %cst_15 = arith.constant dense<0.000000e+00> : vector<1x8x128xf32>
    %25 = tpu.matmul %23, %24, %cst_15 {dimension_numbers = #tpu.dot_dimension_numbers<[2], [1], [1], [2], [0, 0, 0, 1, 1, 2], [0], [0]>} : vector<1x8x128xf32>, vector<1x128x128xf32>, vector<1x8x128xf32> -> vector<1x8x128xf32>
    "tpu.trace_stop"() : () -> ()
    %26 = vector.shape_cast %25 : vector<1x8x128xf32> to vector<8x128xf32>
    %c0_16 = arith.constant 0 : index
    %c0_17 = arith.constant 0 : index
    %27 = vector.load %arg5[%c0_16, %c0_17] : memref<128x128xf32, #tpu.memory_space<vmem>>, vector<128x128xf32>
    %cst_18 = arith.constant dense<0.000000e+00> : vector<8x128xf32>
    %28 = tpu.matmul %26, %27, %cst_18 {dimension_numbers = #tpu.dot_dimension_numbers<[1], [0], [0], [1], [0, 0, 1, 1], [], []>} : vector<8x128xf32>, vector<128x128xf32>, vector<8x128xf32> -> vector<8x128xf32>
    %cst_19 = arith.constant 0.000000e+00 : f32
    %29 = vector.broadcast %cst_19 : f32 to vector<8x128xf32>
    %30 = arith.maximumf %28, %29 : vector<8x128xf32>
    %c0_20 = arith.constant 0 : index
    %c0_21 = arith.constant 0 : index
    %31 = vector.load %arg6[%c0_20, %c0_21] : memref<128x128xf32, #tpu.memory_space<vmem>>, vector<128x128xf32>
    %cst_22 = arith.constant dense<0.000000e+00> : vector<8x128xf32>
    %32 = tpu.matmul %30, %31, %cst_22 {dimension_numbers = #tpu.dot_dimension_numbers<[1], [0], [0], [1], [0, 0, 1, 1], [], []>} : vector<8x128xf32>, vector<128x128xf32>, vector<8x128xf32> -> vector<8x128xf32>
    %cst_23 = arith.constant 0.000000e+00 : f32
    %33 = vector.broadcast %cst_23 : f32 to vector<8x128xf32>
    %34 = arith.maximumf %32, %33 : vector<8x128xf32>
    %35 = vector.shape_cast %34 : vector<8x128xf32> to vector<1x8x128xf32>
    %c0_24 = arith.constant 0 : index
    %c0_25 = arith.constant 0 : index
    %c0_26 = arith.constant 0 : index
    %36 = vector.load %arg7[%c0_24, %c0_25, %c0_26] : memref<1x8x128xf32, #tpu.memory_space<vmem>>, vector<1x8x128xf32>
    tpu.vector_store %arg7[%c0_24, %c0_25, %c0_26], %35 {strides = array<i32>} : memref<1x8x128xf32, #tpu.memory_space<vmem>>, vector<1x8x128xf32>,
    return
  }
  func.func @transform_0(%arg0: i32) -> (i32, i32, i32) {
    %c0_i32 = arith.constant 0 : i32
    %c0_i32_0 = arith.constant 0 : i32
    %c0_i32_1 = arith.constant 0 : i32
    return %arg0, %c0_i32, %c0_i32_0 : i32, i32, i32
  }
  func.func @transform_1(%arg0: i32) -> (i32, i32, i32) {
    %c0_i32 = arith.constant 0 : i32
    %c0_i32_0 = arith.constant 0 : i32
    %c0_i32_1 = arith.constant 0 : i32
    %c0_i32_2 = arith.constant 0 : i32
    return %c0_i32, %c0_i32_0, %c0_i32_1 : i32, i32, i32
  }
  func.func @transform_2(%arg0: i32) -> (i32, i32) {
    %c0_i32 = arith.constant 0 : i32
    %c0_i32_0 = arith.constant 0 : i32
    %c0_i32_1 = arith.constant 0 : i32
    return %c0_i32, %c0_i32_0 : i32, i32
  }
  func.func @transform_3(%arg0: i32) -> (i32, i32) {
    %c0_i32 = arith.constant 0 : i32
    %c0_i32_0 = arith.constant 0 : i32
    %c0_i32_1 = arith.constant 0 : i32
    return %c0_i32, %c0_i32_0 : i32, i32
  }
  func.func @transform_4(%arg0: i32) -> (i32, i32) {
    %c0_i32 = arith.constant 0 : i32
    %c0_i32_0 = arith.constant 0 : i32
    %c0_i32_1 = arith.constant 0 : i32
    return %c0_i32, %c0_i32_0 : i32, i32
  }
  func.func @transform_5(%arg0: i32) -> (i32, i32) {
    %c0_i32 = arith.constant 0 : i32
    %c0_i32_0 = arith.constant 0 : i32
    %c0_i32_1 = arith.constant 0 : i32
    return %c0_i32, %c0_i32_0 : i32, i32
  }
  func.func @transform_6(%arg0: i32) -> (i32, i32, i32) {
    %c0_i32 = arith.constant 0 : i32
    %c0_i32_0 = arith.constant 0 : i32
    %c0_i32_1 = arith.constant 0 : i32
    return %arg0, %c0_i32, %c0_i32_0 : i32, i32, i32
  }
}

</mosaic_0001>

<bundles_post_ra>
// kernel: bad_transformer_block.1
= control target key start
LH: loop header
LB: loop body
LE: loop exit
PB: predicated region body
PF: predicated region fallthrough
CT: control target
= control target key end

     0   :  { %11 = vsyncpa [#allocation3], 0  ;;  %s1946_s0 = inlined_call_operand.vmem [shape: f32[2,8,128], index: 0, kind: input, shape index: {}]   ;;  %s1947_s1 = inlined_call_operand.vmem [shape: f32[1,128,128], index: 1, kind: input, shape index: {}]   ;;  %s1948_s2 = inlined_call_operand.vmem [shape: f32[128,128], index: 2, kind: input, shape index: {}]   ;;  %s1949_s3 = inlined_call_operand.vmem [shape: f32[128,128], index: 3, kind: input, shape index: {}]   ;;  %s1950_s4 = inlined_call_operand.vmem [shape: f32[128,128], index: 4, kind: input, shape index: {}]   ;;  %s1951_s5 = inlined_call_operand.vmem [shape: f32[128,128], index: 5, kind: input, shape index: {}]   ;;  %s1952_s6 = inlined_call_operand.hbm [shape: f32[2,8,128], index: 6, kind: output, shape index: {}]  }
   0x1   :  { %13 = vsyncpa [#allocation3 + $0x1], 0  ;;  %s1579_s21 = smov 0   ;;  %s1581_s22 = smov 0  }
   0x2   :  { %s1583_s23 = smov 0   ;;  %s1585_s24 = smov 0  }
   0x3 LB: > { %s1600_s25 = sadd.s32 4294967295, %s1538_s24   ;;  %s981_s26 = sadd.s32 4294967294, %s1538_s24   ;;  %s1538_s24 = sphi %s1585_s24, %s1958_s24   ;;  %s1534_s23 = sphi %s1583_s23, %s1957_s23   ;;  %s1530_s22 = sphi %s1581_s22, %s1956_s22   ;;  %s1526_s21 = sphi %s1579_s21, %s1955_s21  }
   0x4   : > { %s1604_s27 = sadd.s32 1, %s1538_s24   ;;  %s157_s28 = sadd.s32 1, %s1534_s23 }
   0x5   : > { %s154_s29 = ssub.s32 %s1538_s24, %s1604_s27  ;;  %p167_p0 = scmp.ne.s32.totalorder %s1534_s23, %s1530_s22 }
   0x6   : > { %p155_p1 = scmp.eq.s32.totalorder %s154_s29, 0  ;;  %p168_p2 = scmp.eq.s32.totalorder %s1600_s25, 1 }
   0x7   : > { %p173_p3 = scmp.ne.s32.totalorder %s1530_s22, %s1526_s21  ;;  %p174_p4 = scmp.eq.s32.totalorder %s981_s26, 1 }
   0x8   : > { %s1615_s30 = scalar_select %p155_p1, %s1534_s23, %s157_s28  }
   0x9   : > { %p1617_p5 = por %p168_p2, %p167_p0  ;;  %p1621_p6 = por %p174_p4, %p173_p3 }
   0xa   : > { %p984_p7 = scmp.ge.s32.totalorder %s1538_s24, 1  ;;  %p214_p8 = scmp.lt.s32.totalorder %s1538_s24, 3 }
   0xc   : > { %p215_p9 = pnand %p984_p7, %p214_p8 }
   0xd   : > { %v250_v0 = vld [vmem:[%s1948_s2] sm:$0xff] (!%p215_p9)  ;;  %v251_v1 = vld [vmem:[%s1948_s2 + $0x8] sm:$0xff] (!%p215_p9)  ;;  %v252_v2 = vld [vmem:[%s1948_s2 + $0x10] sm:$0xff] (!%p215_p9)  ;;  %v1540_v3 = vmov (!%p215_p9), 0.0|0.0   ;;  %vm1541_vm0 = vmmov (!%p215_p9), 0   ;;  %v1542_v6 = vmov (!%p215_p9), 0.0  }
   0xe   : > { %218 = sbr.rel (%p215_p9) target bundleno = 1710 (0x6ae), region = 44  ;;  %1310 = vmatprep.subr.bf16.mxu0 (!%p215_p9), %v1540_v3  ;;  %v1311_v4 = vpack.c.bf16 (!%p215_p9), %v251_v1, %v250_v0  ;;  %v253_v5 = vld [vmem:[%s1948_s2 + $0x18] sm:$0xff] (!%p215_p9)  ;;  %1141 = vmatprep.mubr.msk.f32.mxu0 (!%p215_p9), %vm1541_vm0, %v1542_v6  ;;  %v254_v8 = vld [vmem:[%s1948_s2 + $0x20] sm:$0xff] (!%p215_p9)  ;;  %v255_v9 = vld [vmem:[%s1948_s2 + $0x28] sm:$0xff] (!%p215_p9)  ;;  %p243_p10 = scmp.lt.s32.totalorder (!%p215_p9), %s1600_s25, 1  ;;  %vm469_vm3 = vcmask (!%p215_p9), 64512  }
   0xf   : > { %1334 = vmatprep.subr.bf16.mxu1 (!%p215_p9), %v1540_v3  ;;  %1176 = vmatprep.mubr.msk.f32.mxu1 (!%p215_p9), %vm1541_vm0, %v1542_v6  ;;  %v1314_v7 = vpack.c.bf16 (!%p215_p9), %v253_v5, %v252_v2  ;;  %v337_v10 = vld [vmem:[%s1949_s3] sm:$0xff] (!%p215_p9)  ;;  %v338_v11 = vld [vmem:[%s1949_s3 + $0x8] sm:$0xff] (!%p215_p9)  ;;  %v339_v12 = vld [vmem:[%s1949_s3 + $0x10] sm:$0xff] (!%p215_p9)  ;;  %v1317_v14 = vpack.c.bf16 (!%p215_p9), %v255_v9, %v254_v8  ;;  %s1004_s11 = sshll.u32 (!%p215_p9), %s1600_s25, 7 }
  0x10   : > { %1312 = vmatpush3.bf16.msra.mxu0 (!%p215_p9), %v1311_v4  ;;  %v340_v13 = vld [vmem:[%s1949_s3 + $0x18] sm:$0xff] (!%p215_p9)  ;;  %v1335_v15 = vpack.c.bf16 (!%p215_p9), %v338_v11, %v337_v10  ;;  %v256_v16 = vld [vmem:[%s1948_s2 + $0x30] sm:$0xff] (!%p215_p9)  ;;  %v341_v19 = vld [vmem:[%s1949_s3 + $0x20] sm:$0xff] (!%p215_p9) }
  0x11   : > { %1313 = vmatprep.subr.bf16.mxu0 (!%p215_p9), %v1540_v3  ;;  %v257_v17 = vld [vmem:[%s1948_s2 + $0x38] sm:$0xff] (!%p215_p9)  ;;  %v1338_v18 = vpack.c.bf16 (!%p215_p9), %v340_v13, %v339_v12  ;;  %v342_v20 = vld [vmem:[%s1949_s3 + $0x28] sm:$0xff] (!%p215_p9)  ;;  %v258_v22 = vld [vmem:[%s1948_s2 + $0x40] sm:$0xff] (!%p215_p9) }
  0x12   : > { %1336 = vmatpush3.bf16.msra.mxu1 (!%p215_p9), %v1335_v15  ;;  %v1320_v21 = vpack.c.bf16 (!%p215_p9), %v257_v17, %v256_v16  ;;  %v259_v23 = vld [vmem:[%s1948_s2 + $0x48] sm:$0xff] (!%p215_p9)  ;;  %v1341_v24 = vpack.c.bf16 (!%p215_p9), %v342_v20, %v341_v19  ;;  %v343_v25 = vld [vmem:[%s1949_s3 + $0x30] sm:$0xff] (!%p215_p9)  ;;  %v344_v26 = vld [vmem:[%s1949_s3 + $0x38] sm:$0xff] (!%p215_p9) }
  0x13   : > { %1337 = vmatprep.subr.bf16.mxu1 (!%p215_p9), %v1540_v3  ;;  %v1323_v27 = vpack.c.bf16 (!%p215_p9), %v259_v23, %v258_v22  ;;  %v260_v28 = vld [vmem:[%s1948_s2 + $0x50] sm:$0xff] (!%p215_p9)  ;;  %v261_v29 = vld [vmem:[%s1948_s2 + $0x58] sm:$0xff] (!%p215_p9)  ;;  %v1344_v30 = vpack.c.bf16 (!%p215_p9), %v344_v26, %v343_v25  ;;  %v345_v31 = vld [vmem:[%s1949_s3 + $0x40] sm:$0xff] (!%p215_p9) }
  0x14   : > { %1315 = vmatpush3.bf16.msra.mxu0 (!%p215_p9), %v1314_v7  ;;  %v346_v32 = vld [vmem:[%s1949_s3 + $0x48] sm:$0xff] (!%p215_p9)  ;;  %v1326_v33 = vpack.c.bf16 (!%p215_p9), %v261_v29, %v260_v28  ;;  %v262_v34 = vld [vmem:[%s1948_s2 + $0x60] sm:$0xff] (!%p215_p9)  ;;  %v347_v37 = vld [vmem:[%s1949_s3 + $0x50] sm:$0xff] (!%p215_p9) }
  0x15   : > { %1316 = vmatprep.subr.bf16.mxu0 %v1540_v3  ;;  %s244_s19 = scalar_select %p243_p10, %s1600_s25, 1  ;;  %v263_v35 = vld [vmem:[%s1948_s2 + $0x68] sm:$0xff]  ;;  %v1347_v36 = vpack.c.bf16 %v346_v32, %v345_v31  ;;  %v348_v38 = vld [vmem:[%s1949_s3 + $0x58] sm:$0xff]  ;;  %v264_v40 = vld [vmem:[%s1948_s2 + $0x70] sm:$0xff] }
  0x16   : > { %1339 = vmatpush3.bf16.msra.mxu1 %v1338_v18  ;;  %v1329_v39 = vpack.c.bf16 %v263_v35, %v262_v34  ;;  %v265_v41 = vld [vmem:[%s1948_s2 + $0x78] sm:$0xff]  ;;  %v1350_v42 = vpack.c.bf16 %v348_v38, %v347_v37  ;;  %v349_v43 = vld [vmem:[%s1949_s3 + $0x60] sm:$0xff]  ;;  %v350_v44 = vld [vmem:[%s1949_s3 + $0x68] sm:$0xff]  ;;  %s1543_s25 = smov [#allocation2]  }
  0x17   : > { %1340 = vmatprep.subr.bf16.mxu1 %v1540_v3  ;;  %s986_s13 = sshll.u32 %s244_s19, 3  ;;  %v1332_v45 = vpack.c.bf16 %v265_v41, %v264_v40  ;;  %v248_v47 = vld [vmem:[%s1947_s1] sm:$0xff]  ;;  %v1353_v48 = vpack.c.bf16 %v350_v44, %v349_v43  ;;  %v351_v50 = vld [vmem:[%s1949_s3 + $0x70] sm:$0xff]  ;;  %v352_v51 = vld [vmem:[%s1949_s3 + $0x78] sm:$0xff]  ;;  %s1480_s20 = sshll.u32 %s1543_s25, 4  ;;  %s1481_s20 = int_to_ptr.vmem [resolvable:$false] %s1480_s20 }
  0x18   : > { %1318 = vmatpush3.bf16.msra.mxu0 %v1317_v14  ;;  %s246_s9 = scalar_lea.vmem %s1946_s0, %s986_s13  ;;  %v1356_v52 = vpack.c.bf16 %v352_v51, %v351_v50  ;;  %v733_v23 = vld [vmem:[%s1950_s4] sm:$0xff]  ;;  %v735_v25 = vld [vmem:[%s1950_s4 + $0x10] sm:$0xff]  ;;  %s1904_s13 = scalar_lea.hbm %s1952_s6, %s1004_s11 }
  0x19   : > { %1319 = vmatprep.subr.bf16.mxu0 %v1540_v3  ;;  %v247_v46 = vld [vmem:[%s246_s9] sm:$0xff]  ;;  %v739_v32 = vld [vmem:[%s1950_s4 + $0x30] sm:$0xff]  ;;  %s240_s9 = sand.u32 1, %s1530_s22   ;;  %s1482_s19 = scalar_lea.vmem %s1481_s20, 256 }
  0x1a   : > { %1342 = vmatpush3.bf16.msra.mxu1 %v1341_v24  ;;  %v249_v49 = vadd.f32 %v248_v47, %v247_v46  ;;  %v734_v24 = vld [vmem:[%s1950_s4 + $0x8] sm:$0xff]  ;;  %v737_v29 = vld [vmem:[%s1950_s4 + $0x20] sm:$0xff]  ;;  %v743_v38 = vld [vmem:[%s1950_s4 + $0x50] sm:$0xff]  ;;  %s985_s10 = sshll.u32 %s240_s9, 3  ;;  %s909_s17 = scalar_lea.sflag [#allocation3], %s240_s9 }
  0x1b   : > { %1343 = vmatprep.subr.bf16.mxu1 %v1540_v3  ;;  %v1383_v26 = vpack.c.bf16 %v734_v24, %v733_v23  ;;  %v741_v35 = vld [vmem:[%s1950_s4 + $0x40] sm:$0xff]  ;;  %v747_v44 = vld [vmem:[%s1950_s4 + $0x70] sm:$0xff]  ;;  %v831_v24 = vld [vmem:[%s1951_s5 + $0x58] sm:$0xff]  ;;  %s242_s12 = scalar_lea.vmem [#allocation2], %s985_s10 }
  0x1c   : > { %1321 = vmatpush3.bf16.msra.mxu0 %v1320_v21  ;;  %v745_v41 = vld [vmem:[%s1950_s4 + $0x60] sm:$0xff]  ;;  %v830_v23 = vld [vmem:[%s1951_s5 + $0x50] sm:$0xff]  ;;  %s922_s14 = sshll.u32 %s242_s12, 4  ;;  %s1906_s14 = int_to_ptr.vmem [resolvable:$true] %s922_s14 }
  0x1d   : > { %1322 = vmatprep.subr.bf16.mxu0 %v1540_v3  ;;  %s1476_s18 = scalar_lea.vmem %s1906_s14, 128  ;;  %p1483_p0 = scmp.lt.s32.totalorder %s1906_s14, %s1481_s20 }
  0x1e   : > { %1345 = vmatpush3.bf16.msra.mxu1 %v1344_v30  ;;  %v738_v30 = vld [vmem:[%s1950_s4 + $0x28] sm:$0xff]  ;;  %p1477_p11 = scmp.ne.s32.totalorder %s1906_s14, %s1476_s18  ;;  %p1484_p1 = scmp.lt.s32.totalorder %s1482_s19, %s1476_s18 }
  0x1f   : > { %1346 = vmatprep.subr.bf16.mxu1 %v1540_v3  ;;  %v1389_v31 = vpack.c.bf16 %v738_v30, %v737_v29 }
  0x20   : > { %1324 = vmatpush3.bf16.msra.mxu0 %v1323_v27  ;;  %v736_v27 = vld [vmem:[%s1950_s4 + $0x18] sm:$0xff]  ;;  %p1478_p12 = pnand %p1477_p11, %p1617_p5  ;;  %p1485_p2 = por %p1484_p1, %p1483_p0 }
  0x21   : > { %1325 = vmatprep.subr.bf16.mxu0 %v1540_v3  ;;  %v1386_v28 = vpack.c.bf16 %v736_v27, %v735_v25  ;;  %v1422_v25 = vpack.c.bf16 %v831_v24, %v830_v23  ;;  %v833_v27 = vld [vmem:[%s1951_s5 + $0x68] sm:$0xff] }
  0x22   : > { %1348 = vmatpush3.bf16.msra.mxu1 %v1347_v36  ;;  %v742_v36 = vld [vmem:[%s1950_s4 + $0x48] sm:$0xff]  ;;  %p1479_p13 = pneg %p1478_p12 }
  0x23   : > { %1349 = vmatprep.subr.bf16.mxu1 %v1540_v3  ;;  %v1395_v37 = vpack.c.bf16 %v742_v36, %v741_v35 }
  0x24   : > { %1327 = vmatpush3.bf16.msra.mxu0 %v1326_v33  ;;  %v740_v33 = vld [vmem:[%s1950_s4 + $0x38] sm:$0xff]  ;;  %p1486_p3 = pnand %p1485_p2, %p1479_p13 }
  0x25   : > { %1328 = vmatprep.subr.bf16.mxu0 %v1540_v3  ;;  %v1392_v34 = vpack.c.bf16 %v740_v33, %v739_v32  ;;  %v835_v32 = vld [vmem:[%s1951_s5 + $0x78] sm:$0xff] }
  0x26   : > { %1351 = vmatpush3.bf16.msra.mxu1 %v1350_v42  ;;  %v746_v42 = vld [vmem:[%s1950_s4 + $0x68] sm:$0xff] }
  0x27   : > { %1352 = vmatprep.subr.bf16.mxu1 %v1540_v3  ;;  %v1401_v43 = vpack.c.bf16 %v746_v42, %v745_v41 }
  0x28   : > { %1330 = vmatpush3.bf16.msra.mxu0 %v1329_v39  ;;  %v744_v39 = vld [vmem:[%s1950_s4 + $0x58] sm:$0xff] }
  0x29   : > { %1331 = vmatprep.subr.bf16.mxu0 %v1540_v3  ;;  %v1398_v40 = vpack.c.bf16 %v744_v39, %v743_v38 }
  0x2a   : > { %1354 = vmatpush3.bf16.msra.mxu1 %v1353_v48 }
  0x2b   : > { %1355 = vmatprep.subr.bf16.mxu1 %v1540_v3 }
  0x2c   : > { %1333 = vmatpush3.bf16.msra.mxu0 %v1332_v45  ;;  %v748_v45 = vld [vmem:[%s1950_s4 + $0x78] sm:$0xff] }
  0x2d   : > { %v1404_v46 = vpack.c.bf16 %v748_v45, %v747_v44 }
  0x2e   : > { %1357 = vmatpush3.bf16.msra.mxu1 %v1356_v52 }
  0x2f   : > { %1142 = vmatmul.mubr.f32.vlgmr.msra.gmra.mrb[0].mxu0 %v249_v49  ;;  %1358 = vmatprep.subr.bf16.mxu1 %v1540_v3 }
 0x102   : > { %v332_v53 = vpop.f32.mrb[0].mxu0 }
 0x103   : > { %v336_v54 = vmax.f32 %v332_v53, 0.0  ;;  %v1143_v55 = vpop.f32.mrb[1].mxu0 }
 0x105   : > { %1177 = vmatmul.mubr.f32.vlgmr.msra.gmra.mrb[0].mxu1 %v336_v54 }
 0x106   : > { %1237 = vmatprep.mubr.msk.f32.mxu1 %vm1541_vm0, %v1542_v6 }
 0x1d8   : > { %v419_v56 = vpop.f32.mrb[0].mxu1 }
 0x1d9   : > { %v423_v57 = vmax.f32 %v419_v56, 0.0  ;;  %v1178_v58 = vpop.f32.mrb[1].mxu1 }
 0x1db   : > { %v424_v59 = vmul.f32 %v423_v57, %v423_v57 }
 0x1dd   : > { %425 = vadd.xlane.f32.xlu0 %v424_v59 }
 0x26a   : > { %v426_v60 = vpop.xlane.xlu0 %425 }
 0x26b   : > { %1472 = vrsqrt.f32 %v426_v60  ;;  %vm429_vm1 = vcmp.eq.f32.partialorder %v426_v60, inf  ;;  %v432_v63 = vand.u32 2147483648, %v426_v60  ;;  %vm431_vm2 = vcmp.eq.f32.partialorder %v426_v60, 0.0 }
 0x275   : > { %v1473_v61 = vpop.eup %1472 }
 0x276   : > { %v428_v62 = vmul.f32 %v1473_v61, %v426_v60 }
 0x278   : > { %v430_v0 = vsel %vm429_vm1, %v426_v60, %v428_v62 }
 0x279   : > { %v433_v1 = vsel %vm431_vm2, %v432_v63, %v430_v0 }
 0x27a   : > { %v434_v2 = vadd.f32 1e-06, %v433_v1 }
 0x27c   : > { %1474 = vrcp.f32 %v434_v2 }
 0x286   : > { %v1475_v4 = vpop.eup %1474 }
 0x287   : > { %v1754_v5 = vmul.f32 %v1475_v4, %v423_v57 }
 0x289   : > { %437 = vxpose.xlu0.b32.start.end [1/1] (short) %v1754_v5, 128  ;;  %1179 = vmatprep.subr.mxu0 %v1754_v5 }
 0x28a   : > { %1180 = vmatpush3.msra.mxu0 %v1754_v5 }
 0x28b   : > { %1382 = vmatprep.subr.bf16.mxu0 %v1540_v3 }
 0x309   : > { %v453_v7 = vpop.trf.xlu0 }
 0x30a   : > { %1181 = vmatprep.mubr.msk.f32.mxu0 %vm469_vm3, %v453_v7 }
 0x30d   : > { %v454_v8 = vpop.trf.xlu0 }
 0x30e   : > { %1182 = vmatmul.mubr.msk.f32.vlgmr.msra.gmra.mrb[2].mxu0 %vm469_vm3, %v454_v8 }
 0x30f   : > { %1384 = vmatpush3.bf16.msra.mxu0 %v1383_v26  ;;  %v832_v26 = vld [vmem:[%s1951_s5 + $0x60] sm:$0xff] }
 0x310   : > { %1385 = vmatprep.subr.bf16.mxu0 %v1540_v3 }
 0x311   : > { %v455_v9 = vpop.trf.xlu0 }
 0x312   : > { %1184 = vmatprep.mubr.msk.f32.mxu0 %vm469_vm3, %v455_v9 }
 0x313   : > { %1387 = vmatpush3.bf16.msra.mxu0 %v1386_v28  ;;  %v1425_v28 = vpack.c.bf16 %v833_v27, %v832_v26 }
 0x314   : > { %1388 = vmatprep.subr.bf16.mxu0 %v1540_v3 }
 0x315   : > { %v456_v10 = vpop.trf.xlu0 }
 0x316   : > { %1185 = vmatmul.mubr.msk.f32.gmra.mrb[4].mxu0 %vm469_vm3, %v456_v10  ;;  %v820_v10 = vld [vmem:[%s1951_s5] sm:$0xff] }
 0x317   : > { %1390 = vmatpush3.bf16.msra.mxu0 %v1389_v31  ;;  %v834_v31 = vld [vmem:[%s1951_s5 + $0x70] sm:$0xff] }
 0x318   : > { %1391 = vmatprep.subr.bf16.mxu0 %v1540_v3  ;;  %v1428_v33 = vpack.c.bf16 %v835_v32, %v834_v31 }
 0x319   : > { %v457_v11 = vpop.trf.xlu0 }
 0x31a   : > { %1187 = vmatprep.mubr.msk.f32.mxu0 %vm469_vm3, %v457_v11  ;;  %v821_v11 = vld [vmem:[%s1951_s5 + $0x8] sm:$0xff] }
 0x31b   : > { %1393 = vmatpush3.bf16.msra.mxu0 %v1392_v34 }
 0x31c   : > { %1394 = vmatprep.subr.bf16.mxu0 %v1540_v3 }
 0x31d   : > { %v458_v12 = vpop.trf.xlu0 }
 0x31e   : > { %1188 = vmatmul.mubr.msk.f32.gmra.mrb[6].mxu0 %vm469_vm3, %v458_v12  ;;  %v822_v12 = vld [vmem:[%s1951_s5 + $0x10] sm:$0xff] }
 0x31f   : > { %1396 = vmatpush3.bf16.msra.mxu0 %v1395_v37 }
 0x320   : > { %1397 = vmatprep.subr.bf16.mxu0 %v1540_v3 }
 0x321   : > { %v459_v13 = vpop.trf.xlu0 }
 0x322   : > { %1190 = vmatprep.mubr.msk.f32.mxu0 %vm469_vm3, %v459_v13  ;;  %v1407_v13 = vpack.c.bf16 %v821_v11, %v820_v10 }
 0x323   : > { %1399 = vmatpush3.bf16.msra.mxu0 %v1398_v40 }
 0x324   : > { %1400 = vmatprep.subr.bf16.mxu0 %v1540_v3 }
 0x325   : > { %v460_v14 = vpop.trf.xlu0 }
 0x326   : > { %1191 = vmatmul.mubr.msk.f32.gmra.mrb[8].mxu0 %vm469_vm3, %v460_v14 }
 0x327   : > { %1402 = vmatpush3.bf16.msra.mxu0 %v1401_v43 }
 0x328   : > { %1403 = vmatprep.subr.bf16.mxu0 %v1540_v3 }
 0x329   : > { %v461_v15 = vpop.trf.xlu0 }
 0x32a   : > { %1193 = vmatprep.mubr.msk.f32.mxu0 %vm469_vm3, %v461_v15  ;;  %v825_v15 = vld [vmem:[%s1951_s5 + $0x28] sm:$0xff] }
 0x32b   : > { %1405 = vmatpush3.bf16.msra.mxu0 %v1404_v46 }
 0x32d   : > { %v462_v16 = vpop.trf.xlu0 }
 0x32e   : > { %1194 = vmatmul.mubr.msk.f32.gmra.mrb[10].mxu0 %vm469_vm3, %v462_v16 }
 0x331   : > { %v463_v17 = vpop.trf.xlu0 }
 0x332   : > { %1196 = vmatprep.mubr.msk.f32.mxu0 %vm469_vm3, %v463_v17  ;;  %v826_v17 = vld [vmem:[%s1951_s5 + $0x30] sm:$0xff] }
 0x335   : > { %v464_v18 = vpop.trf.xlu0 }
 0x336   : > { %1197 = vmatmul.mubr.msk.f32.gmra.mrb[12].mxu0 %vm469_vm3, %v464_v18  ;;  %v827_v18 = vld [vmem:[%s1951_s5 + $0x38] sm:$0xff] }
 0x339   : > { %v465_v19 = vpop.trf.xlu0 }
 0x33a   : > { %1199 = vmatprep.mubr.msk.f32.mxu0 %vm469_vm3, %v465_v19  ;;  %v1416_v19 = vpack.c.bf16 %v827_v18, %v826_v17 }
 0x33d   : > { %v466_v20 = vpop.trf.xlu0 }
 0x33e   : > { %1200 = vmatmul.mubr.msk.f32.gmra.mrb[14].mxu0 %vm469_vm3, %v466_v20  ;;  %v828_v20 = vld [vmem:[%s1951_s5 + $0x40] sm:$0xff] }
 0x341   : > { %v467_v21 = vpop.trf.xlu0 }
 0x342   : > { %1202 = vmatprep.mubr.msk.f32.mxu0 %vm469_vm3, %v467_v21  ;;  %v829_v21 = vld [vmem:[%s1951_s5 + $0x48] sm:$0xff] }
 0x345   : > { %v468_v22 = vpop.trf.xlu0 }
 0x346   : > { %1203 = vmatmul.mubr.msk.f32.gmra.mrb[16].mxu0 %vm469_vm3, %v468_v22  ;;  %v1419_v22 = vpack.c.bf16 %v829_v21, %v828_v20 }
 0x347   : > { %1272 = vmatprep.mubr.msk.f32.mxu0 %vm1541_vm0, %v1542_v6 }
 0x3e1   : > { %v1183_v47 = vpop.f32.mrb[2].mxu0 }
 0x3e2   : > { %v584_v48 = vpop.f32.mrb[3].mxu0 }
 0x3e3   : > { %v1359_v49 = vpack.c.bf16 %v1183_v47, %v584_v48 }
 0x3e5   : > { %1360 = vmatpush3.bf16.msra.mxu1 %v1359_v49 }
 0x3e6   : > { %1361 = vmatprep.subr.bf16.mxu1 %v1540_v3 }
 0x3e9   : > { %v1186_v50 = vpop.f32.mrb[4].mxu0 }
 0x3ea   : > { %v594_v51 = vpop.f32.mrb[5].mxu0 }
 0x3eb   : > { %v1362_v52 = vpack.c.bf16 %v1186_v50, %v594_v51 }
 0x3ed   : > { %1363 = vmatpush3.bf16.msra.mxu1 %v1362_v52 }
 0x3ee   : > { %1364 = vmatprep.subr.bf16.mxu1 %v1540_v3 }
 0x3f1   : > { %v1189_v53 = vpop.f32.mrb[6].mxu0 }
 0x3f2   : > { %v604_v54 = vpop.f32.mrb[7].mxu0 }
 0x3f3   : > { %v1365_v55 = vpack.c.bf16 %v1189_v53, %v604_v54 }
 0x3f5   : > { %1366 = vmatpush3.bf16.msra.mxu1 %v1365_v55 }
 0x3f6   : > { %1367 = vmatprep.subr.bf16.mxu1 %v1540_v3 }
 0x3f9   : > { %v1192_v56 = vpop.f32.mrb[8].mxu0 }
 0x3fa   : > { %v614_v57 = vpop.f32.mrb[9].mxu0 }
 0x3fb   : > { %v1368_v58 = vpack.c.bf16 %v1192_v56, %v614_v57 }
 0x3fd   : > { %1369 = vmatpush3.bf16.msra.mxu1 %v1368_v58 }
 0x3fe   : > { %1370 = vmatprep.subr.bf16.mxu1 %v1540_v3 }
 0x401   : > { %v1195_v59 = vpop.f32.mrb[10].mxu0 }
 0x402   : > { %v624_v60 = vpop.f32.mrb[11].mxu0 }
 0x403   : > { %v1371_v61 = vpack.c.bf16 %v1195_v59, %v624_v60 }
 0x405   : > { %1372 = vmatpush3.bf16.msra.mxu1 %v1371_v61 }
 0x406   : > { %1373 = vmatprep.subr.bf16.mxu1 %v1540_v3 }
 0x409   : > { %v1198_v62 = vpop.f32.mrb[12].mxu0 }
 0x40a   : > { %v634_v63 = vpop.f32.mrb[13].mxu0 }
 0x40b   : > { %v1374_v0 = vpack.c.bf16 %v1198_v62, %v634_v63 }
 0x40d   : > { %1375 = vmatpush3.bf16.msra.mxu1 %v1374_v0 }
 0x40e   : > { %1376 = vmatprep.subr.bf16.mxu1 %v1540_v3 }
 0x411   : > { %v1201_v1 = vpop.f32.mrb[14].mxu0 }
 0x412   : > { %v644_v2 = vpop.f32.mrb[15].mxu0 }
 0x413   : > { %v1377_v4 = vpack.c.bf16 %v1201_v1, %v644_v2 }
 0x415   : > { %1378 = vmatpush3.bf16.msra.mxu1 %v1377_v4 }
 0x416   : > { %1379 = vmatprep.subr.bf16.mxu1 %v1540_v3 }
 0x419   : > { %v1204_v7 = vpop.f32.mrb[16].mxu0 }
 0x41a   : > { %v654_v8 = vpop.f32.mrb[17].mxu0 }
 0x41b   : > { %v1380_v9 = vpack.c.bf16 %v1204_v7, %v654_v8 }
 0x41d   : > { %1381 = vmatpush3.bf16.msra.mxu1 %v1380_v9 }
 0x41e   : > { %1406 = vmatprep.subr.bf16.mxu1 %v1540_v3 }
 0x420   : > { %1238 = vmatmul.mubr.f32.vlgmr.msra.gmra.mrb[2].mxu1 %v1754_v5  ;;  %v823_v5 = vld [vmem:[%s1951_s5 + $0x18] sm:$0xff] }
 0x421   : > { %1307 = vmatprep.mubr.msk.f32.mxu1 %vm1541_vm0, %v1542_v6  ;;  %1408 = vmatpush3.bf16.msra.mxu1 %v1407_v13  ;;  %v1410_v14 = vpack.c.bf16 %v823_v5, %v822_v12  ;;  %v824_v6 = vld [vmem:[%s1951_s5 + $0x20] sm:$0xff] }
 0x422   : > { %1409 = vmatprep.subr.bf16.mxu1 %v1540_v3  ;;  %v1413_v16 = vpack.c.bf16 %v825_v15, %v824_v6 }
 0x425   : > { %1411 = vmatpush3.bf16.msra.mxu1 %v1410_v14 }
 0x426   : > { %1412 = vmatprep.subr.bf16.mxu1 %v1540_v3 }
 0x429   : > { %1414 = vmatpush3.bf16.msra.mxu1 %v1413_v16 }
 0x42a   : > { %1415 = vmatprep.subr.bf16.mxu1 %v1540_v3 }
 0x42d   : > { %1417 = vmatpush3.bf16.msra.mxu1 %v1416_v19 }
 0x42e   : > { %1418 = vmatprep.subr.bf16.mxu1 %v1540_v3 }
 0x431   : > { %1420 = vmatpush3.bf16.msra.mxu1 %v1419_v22 }
 0x432   : > { %1421 = vmatprep.subr.bf16.mxu1 %v1540_v3 }
 0x435   : > { %1423 = vmatpush3.bf16.msra.mxu1 %v1422_v25 }
 0x436   : > { %1424 = vmatprep.subr.bf16.mxu1 %v1540_v3 }
 0x439   : > { %1426 = vmatpush3.bf16.msra.mxu1 %v1425_v28 }
 0x43a   : > { %1427 = vmatprep.subr.bf16.mxu1 %v1540_v3 }
 0x43d   : > { %1429 = vmatpush3.bf16.msra.mxu1 %v1428_v33 }
 0x4f3   : > { %v729_v29 = vpop.f32.mrb[2].mxu1 }
 0x4f4   : > { %v1239_v30 = vpop.f32.mrb[3].mxu1  ;;  %1273 = vmatmul.mubr.f32.vlgmr.msra.gmra.mrb[18].mxu0 %v729_v29 }
 0x5c7   : > { %v815_v34 = vpop.f32.mrb[18].mxu0 }
 0x5c8   : > { %v819_v35 = vmax.f32 %v815_v34, 0.0  ;;  %v1274_v36 = vpop.f32.mrb[19].mxu0 }
 0x5ca   : > { %1308 = vmatmul.mubr.f32.vlgmr.msra.gmra.mrb[4].mxu1 %v819_v35 }
 0x69d   : > { %v902_v3 = vpop.f32.mrb[4].mxu1 }
 0x69e   : > { %v906_v37 = vmax.f32 %v902_v3, 0.0  ;;  %v1309_v38 = vpop.f32.mrb[5].mxu1 }
 0x6a0   : > { %907 = vst [vmem:[%s242_s12] sm:$0xff] %v906_v37 }
 0x6a1   : > { %1489 = shalt.err (!%p1486_p3)
}
 0x6a2   : > { %s1490_s26 = scalar_lea.hbm %s1904_s13, 128  ;;  %s1494_s9 = scalar_lea.hbm %s1952_s6, 256 }
 0x6a3   : > { %p1491_p4 = scmp.ne.s32.totalorder %s1904_s13, %s1490_s26  ;;  %p1495_p9 = scmp.lt.u32.totalorder %s1904_s13, %s1952_s6 }
 0x6a4   : > { %p1496_p10 = scmp.lt.u32.totalorder %s1494_s9, %s1490_s26  ;;  %p1498_p12 = scmp.lt.u32.totalorder %s1490_s26, %s1904_s13 }
 0x6a5   : > { %p1492_p7 = pnand %p1491_p4, %p1617_p5 }
 0x6a6   : > { %p1497_p11 = por %p1496_p10, %p1495_p9 }
 0x6a7   : > { %p1493_p8 = pneg %p1492_p7 }
 0x6a8   : > { %p1499_p13 = por %p1498_p12, %p1497_p11 }
 0x6aa   : > { %p1500_p0 = pnand %p1499_p13, %p1493_p8 }
 0x6ac   : > { %1503 = shalt.err (!%p1500_p0)
}
 0x6ad   : > { %1430 = dma.vmem_to_hbm [thread:$0]  (%p1617_p5), %s1906_s14, 128, %s1904_s13, %s909_s17  }
 0x6ae PF: > { %p1436_p1 = scmp.ge.s32.totalorder %s1538_s24, 2  ;;  %s934_s12 = sand.u32 1, %s1526_s21  }
 0x6af   : > { %s935_s15 = scalar_lea.sflag [#allocation3], %s934_s12 }
 0x6b0   : > { %p1433_p2 = pnand %p1436_p1, %p1621_p6 }
 0x6b2   : > { %1521 = dma.done.wait (!%p1433_p2), %s935_s15, 128  }
 0x6b3   : > { %1523 = vsyncadd (!%p1433_p2), %s935_s15, 4294967168  ;;  %p16_p3 = scmp.ge.s32.totalorder %s1604_s27, 4   ;;  %s1955_s21 = smov %s1530_s22 }
 0x6b4   : > { %s1956_s22 = smov %s1534_s23  ;;  %s1957_s23 = smov %s1615_s30 }
 0x6b5   : > { %s1958_s24 = smov %s1604_s27  ;;  %18 = sbr.rel (!%p16_p3) target bundleno = 3 (0x3), region = 79 }
 0x6bc   :  { %940 = vsyncpa [#allocation3], 1 }
 0x6bd   :  { %942 = vsyncpa [#allocation3 + $0x1], 1 }

</bundles_post_ra>
